<compile_context>
chip_gen: v7x
topology: tpu7x:2x2x1
jax: 0.10.0
libtpu: 0.0.40
codegen_flags: <defaults>
</compile_context>

<pallas_src>
import functools

import jax
import jax.numpy as jnp
from jax.experimental import pallas as pl
from jax.experimental.pallas import tpu as pltpu

# The reference forward calls F.leaky_relu(x) with no slope argument, i.e. the
# PyTorch default 0.01.  (HiFiGAN's own repo uses LRELU_SLOPE = 0.1; change this
# constant to match that variant / real checkpoints.)
LRELU_SLOPE = 0.01

MIB = 1024 * 1024


def get_padding(kernel_size, dilation=1):
    return int((kernel_size * dilation - dilation) / 2)


def _vmem_budget_bytes():
    """Generation-aware scoped-VMEM budget, also used to size M tiles.

    ~48 MiB on v7x (64 MiB per-TC VMEM), ~96 MiB on v5e/v6e (128 MiB VMEM).
    Falls back to a 48 MiB budget (safe on every generation) if the query fails."""
    cap = 64 * MIB
    try:
        cap = int(getattr(pltpu.get_tpu_info(), "vmem_capacity_bytes", cap))
    except Exception:
        pass
    budget = (cap * 3 // 4 // MIB) * MIB
    return max(40 * MIB, min(budget, 96 * MIB))


def _buffered_spec(block_shape, index_map):
    """Constant-index BlockSpec for weights/bias: fetched once, single buffer."""
    try:
        return pl.BlockSpec(block_shape, index_map, pipeline_mode=pl.Buffered(1))
    except Exception:
        # Older BlockSpec without pipeline_mode: fall back to default buffering.
        return pl.BlockSpec(block_shape, index_map)


# ----------------------------------------------------------------------------
# Trace-time layout helpers: stride-grouped im2col (reshape + shifted concat)
# ----------------------------------------------------------------------------
def _grouped_patches(x, k_size, stride, pad):
    """x: (S, H, Cin) -> (S*hout, nq*stride*Cin), taps regrouped by q = k // stride."""
    S, H, Cin = x.shape
    hout = (H + 2 * pad - k_size) // stride + 1
    assert hout >= 1
    nq = -(-k_size // stride)                                   # ceil(K/stride)
    Hg = max(hout + nq - 1, -(-(H + pad) // stride))
    back = Hg * stride - H - pad
    xp = jnp.pad(x, ((0, 0), (pad, back), (0, 0)))              # zero pad along H
    xg = xp.reshape(S, Hg, stride * Cin)                        # pure reshape (row-major)
    cols = [xg[:, q:q + hout, :] for q in range(nq)]            # shifted row-groups
    xcat = jnp.concatenate(cols, axis=-1)                       # (S, hout, nq*stride*Cin)
    return xcat.reshape(S * hout, nq * stride * Cin), hout


def _grouped_weight(w, stride):
    """w: (K, Cin, Cout) -> (nq*stride*Cin, Cout), zero-padding taps beyond K."""
    K, Cin, Cout = w.shape
    nq = -(-K // stride)
    wp = jnp.pad(w, ((0, nq * stride - K), (0, 0), (0, 0)))
    return wp.reshape(nq * stride * Cin, Cout)                  # tap-major, cin-minor


def fold_weight_norm(v, g):
    """Fold a torch weight_norm (weight_v, weight_g) pair into a plain weight.

    v: (Cout, Cin, K, 1), g: (Cout, 1, 1, 1)  ->  (K, Cin, Cout).  Needed when
    loading real PyTorch checkpoints (forward-equivalent to weight_norm Conv2d)."""
    norm = jnp.sqrt(jnp.sum(v * v, axis=(1, 2, 3), keepdims=True))
    w = (g / norm) * v
    return jnp.transpose(w[..., 0], (2, 1, 0))


# ----------------------------------------------------------------------------
# Pallas kernel 1: fused matmul + bias + leaky-ReLU over one M tile (stride-3)
# ----------------------------------------------------------------------------
def _matmul_bias_act_kernel(x_ref, w_ref, b_ref, o_ref, *, apply_act):
    # x_ref: (tm, Kq) bf16   w_ref: (Kq, Cout) bf16 (VMEM-resident, single buffer)
    # b_ref: (1, Cout) f32   o_ref: (tm, Cout) bf16
    acc = jnp.dot(x_ref[...], w_ref[...], preferred_element_type=jnp.float32)
    acc = acc + b_ref[...]
    if apply_act:
        acc = jnp.where(acc >= 0.0, acc, LRELU_SLOPE * acc)
    o_ref[...] = acc.astype(o_ref.dtype)


def _pick_tile_m(kq, cout, m, budget):
    # Footprint budget: double-buffered bf16 x & out blocks + single-buffered
    # bf16 weights + ~6 MiB margin (bias, f32 accumulator, Mosaic internal scratch).
    avail = budget - kq * cout * 2 - 6 * MIB
    per_row = 2 * 2 * kq + 2 * 2 * cout
    tm = max(256, min(1024, (avail // per_row) // 256 * 256))
    m_up = -(-m // 256) * 256                                   # don't over-pad tiny M
    return min(tm, m_up)


def conv_strided_layer(x, w, bias, *, stride, pad, apply_act, budget):
    """One strided (K,1)-Conv2d (+ bias, leaky-ReLU) as a single Pallas matmul.

    x: (S, H, Cin) bf16; w: (K, Cin, Cout) f32; bias: (Cout,) f32.
    Returns (S, hout, Cout) bf16."""
    S, H, Cin = x.shape
    K, _, Cout = w.shape

    x_cat, hout = _grouped_patches(x, K, stride, pad)           # (M, Kq) bf16
    w_cat = _grouped_weight(w, stride).astype(jnp.bfloat16)     # (Kq, Cout) bf16
    M, Kq = x_cat.shape

    # Keep the contraction dim a bf16-friendly multiple of 16 (zero cols x zero
    # rows leave the result exact).  Layers 2-4 already satisfy this.
    kq_pad = -(-Kq // 16) * 16
    if kq_pad != Kq:
        x_cat = jnp.pad(x_cat, ((0, 0), (0, kq_pad - Kq)))
        w_cat = jnp.pad(w_cat, ((0, kq_pad - Kq), (0, 0)))
        Kq = kq_pad

    tm = _pick_tile_m(Kq, Cout, M, budget)
    Mp = pl.cdiv(M, tm) * tm
    if Mp != M:
        x_cat = jnp.pad(x_cat, ((0, Mp - M), (0, 0)))           # padded rows sliced off below

    bias2 = bias.reshape(1, Cout).astype(jnp.float32)

    out = pl.pallas_call(
        functools.partial(_matmul_bias_act_kernel, apply_act=apply_act),
        out_shape=jax.ShapeDtypeStruct((Mp, Cout), jnp.bfloat16),
        grid=(Mp // tm,),
        in_specs=[
            pl.BlockSpec((tm, Kq), lambda m: (m, 0)),
            _buffered_spec((Kq, Cout), lambda m: (0, 0)),   # 1 DMA per layer, 1 buffer
            _buffered_spec((1, Cout), lambda m: (0, 0)),
        ],
        out_specs=pl.BlockSpec((tm, Cout), lambda m: (m, 0)),
        compiler_params=pltpu.CompilerParams(
            # TODO(synk): on v7x verify in the trace that both TensorCores split
            # this axis; if not, switch to pltpu.CORE_PARALLEL / pl.core_map.
            dimension_semantics=("parallel",),
            vmem_limit_bytes=budget,
        ),
    )(x_cat, w_cat, bias2)

    return out[:M].reshape(S, hout, Cout)


# ----------------------------------------------------------------------------
# Pallas kernel 2: stride-1 conv via halo tiles (no 5x im2col duplication)
# ----------------------------------------------------------------------------
def _conv_s1_halo_kernel(x_ref, w_ref, b_ref, o_ref, *, k_size, cin, th, apply_act):
    # x_ref: (1, th + k_size - 1, cin) bf16 halo tile
    # w_ref: (k_size*cin, cout) bf16 (VMEM-resident, single buffer)
    acc = jnp.dot(x_ref[0, 0:th, :], w_ref[0:cin, :],
                  preferred_element_type=jnp.float32)
    for k in range(1, k_size):                                   # static unroll, K-1 dots
        acc = acc + jnp.dot(x_ref[0, k:k + th, :],
                            w_ref[k * cin:(k + 1) * cin, :],
                            preferred_element_type=jnp.float32)
    acc = acc + b_ref[...]
    if apply_act:
        acc = jnp.where(acc >= 0.0, acc, LRELU_SLOPE * acc)
    o_ref[0, :, :] = acc.astype(o_ref.dtype)


def conv_stride1_layer(x, w, bias, *, pad, apply_act, budget):
    """Stride-1 (K,1)-Conv2d without im2col duplication.

    The input is restacked into non-overlapping halo tiles of (th + K - 1) rows
    (only K-1 rows duplicated per tile); the kernel accumulates K shifted
    matmuls from the VMEM-resident tile in f32."""
    S, H, Cin = x.shape
    K, _, Cout = w.shape
    hout = H + 2 * pad - K + 1
    assert hout >= 1

    th = max(8, min(512, -(-hout // 8) * 8))        # output rows per tile (multiple of 8)
    HT = -(-hout // th)
    hpad = HT * th
    halo = K - 1

    # Tile j covers padded rows [j*th, j*th + th + K - 1).
    xp = jnp.pad(x, ((0, 0), (pad, hpad - hout + pad), (0, 0)))
    tiles = jnp.concatenate(
        [xp[:, j * th:j * th + th + halo, :][:, None] for j in range(HT)], axis=1
    ).reshape(S * HT, th + halo, Cin)

    w_cat = w.reshape(K * Cin, Cout).astype(jnp.bfloat16)        # tap-major, cin-minor
    bias2 = bias.reshape(1, Cout).astype(jnp.float32)

    out = pl.pallas_call(
        functools.partial(_conv_s1_halo_kernel, k_size=K, cin=Cin, th=th,
                          apply_act=apply_act),
        out_shape=jax.ShapeDtypeStruct((S * HT, th, Cout), jnp.bfloat16),
        grid=(S * HT,),
        in_specs=[
            pl.BlockSpec((1, th + halo, Cin), lambda i: (i, 0, 0)),
            _buffered_spec((K * Cin, Cout), lambda i: (0, 0)),   # 10 MiB, fetched once
            _buffered_spec((1, Cout), lambda i: (0, 0)),
        ],
        out_specs=pl.BlockSpec((1, th, Cout), lambda i: (i, 0, 0)),
        compiler_params=pltpu.CompilerParams(
            dimension_semantics=("parallel",),
            vmem_limit_bytes=budget,
        ),
    )(tiles, w_cat, bias2)

    return out.reshape(S, hpad, Cout)[:, :hout]


# ----------------------------------------------------------------------------
# Plain-XLA pieces (per perf review): convs[0] and conv_post
# ----------------------------------------------------------------------------
def conv_first_layer_xla(x, w, bias, *, stride, pad):
    # convs[0]: Cin=1, Cout=32.  Tiny contraction + lane-sparse output store ->
    # keep it out of the Pallas/MXU path and let XLA handle it.
    K, Cin, Cout = w.shape
    patches, hout = _grouped_patches(x, K, stride, pad)          # bf16 (M, nq*stride*Cin)
    w_cat = _grouped_weight(w, stride).astype(jnp.bfloat16)
    h = jnp.dot(patches, w_cat, preferred_element_type=jnp.float32) + bias[None, :]
    h = jnp.where(h >= 0.0, h, LRELU_SLOPE * h)
    return h.reshape(x.shape[0], hout, Cout).astype(jnp.bfloat16)


# ----------------------------------------------------------------------------
# DiscriminatorP forward (glue: reflect pad, reshapes, conv_post, fmap layout)
# ----------------------------------------------------------------------------
CONV_CFG = [  # (Cin, Cout, K, stride, pad) for self.convs
    (1, 32, 5, 3, get_padding(5, 1)),
    (32, 128, 5, 3, get_padding(5, 1)),
    (128, 512, 5, 3, get_padding(5, 1)),
    (512, 1024, 5, 3, get_padding(5, 1)),
    (1024, 1024, 5, 1, 2),
]
POST_CFG = (1024, 1, 3, 1, 1)  # conv_post


def init_params(key):
    # weight_norm is a reparametrization; at init it is forward-equivalent to a
    # plain Conv2d, so we initialize plain (K, Cin, Cout) weights.  For real
    # checkpoints, fold (v, g) with fold_weight_norm() first.
    params = []
    cfgs = CONV_CFG + [POST_CFG]
    keys = jax.random.split(key, len(cfgs))
    for k, (cin, cout, ks, _, _) in zip(keys, cfgs):
        kw, kb = jax.random.split(k)
        scale = 1.0 / jnp.sqrt(float(cin * ks))
        w = jax.random.uniform(kw, (ks, cin, cout), jnp.float32, -scale, scale)
        b = jax.random.uniform(kb, (cout,), jnp.float32, -scale, scale)
        params.append((w, b))
    return params


def _to_torch_layout(h, b, period):
    # (S=b*period, Hout, C) -> torch (b, C, Hout, period).  Kept in bf16 (cast
    # to f32 deferred to the loss) to halve fmap write traffic.
    S, Hout, C = h.shape
    return jnp.transpose(h.reshape(b, period, Hout, C), (0, 3, 2, 1))


def discriminator_p_forward(x, params, period):
    # x: (b, c=1, t) float32, NCHW-style like the PyTorch module
    b, c, t = x.shape
    assert c == 1
    if t % period != 0:
        n_pad = period - t % period
        assert n_pad < t, "reflect pad requires t > (period - t % period)"
        x = jnp.pad(x, ((0, 0), (0, 0), (0, n_pad)), mode="reflect")
        t = t + n_pad
    H = t // period
    x4 = x.reshape(b, c, H, period)                                  # torch view
    h = jnp.transpose(x4, (0, 3, 2, 1)).reshape(b * period, H, c)    # (S, H, 1)
    h = h.astype(jnp.bfloat16)

    budget = _vmem_budget_bytes()
    fmap = []

    # convs[0]: plain XLA (trivially cheap, Cout=32 lane-sparse on TPU stores).
    (w0, b0), (_, _, _, s0, p0) = params[0], CONV_CFG[0]
    h = conv_first_layer_xla(h, w0, b0, stride=s0, pad=p0)
    fmap.append(_to_torch_layout(h, b, period))

    # convs[1..3]: stride-3 grouped-im2col Pallas matmuls.
    for (w, bias), (_, _, _, stride, pad) in zip(params[1:4], CONV_CFG[1:4]):
        h = conv_strided_layer(h, w, bias, stride=stride, pad=pad,
                               apply_act=True, budget=budget)
        fmap.append(_to_torch_layout(h, b, period))

    # convs[4]: stride-1 halo-tile Pallas kernel (no 5x im2col blob).
    (w4, b4), (_, _, _, _, p4) = params[4], CONV_CFG[4]
    h = conv_stride1_layer(h, w4, b4, pad=p4, apply_act=True, budget=budget)
    fmap.append(_to_torch_layout(h, b, period))

    # conv_post: 1024 -> 1 channel, K=3, stride 1, pad 1.  Cout=1 is lane-sparse
    # on the MXU, so it is one bf16 contraction in plain XLA (f32 accumulate).
    w_post, b_post = params[5]
    Kp = w_post.shape[0]
    S, H5, _ = h.shape
    patches, _ = _grouped_patches(h, Kp, 1, 1)                       # bf16 (S*H5, Kp*1024)
    w_pc = _grouped_weight(w_post, 1).astype(jnp.bfloat16)           # (Kp*1024, 1)
    logits = jnp.dot(patches, w_pc, preferred_element_type=jnp.float32)
    logits = (logits[:, 0] + b_post[0]).reshape(S, H5)

    post = jnp.transpose(logits.reshape(b, period, H5), (0, 2, 1))   # (b, H5, period)
    fmap.append(post[:, None, :, :])                                 # torch (b, 1, H5, period)
    out = post.reshape(b, H5 * period)                               # torch.flatten(x, 1, -1)
    return out, fmap


if __name__ == "__main__":
    key = jax.random.PRNGKey(0)
    kx, kp = jax.random.split(key)

    batch, channels, t, period = 2, 1, 16, 3   # t % period != 0 -> exercises reflect pad
    x = jax.random.normal(kx, (batch, channels, t), dtype=jnp.float32)
    params = init_params(kp)

    out, fmap = discriminator_p_forward(x, params, period)
    out = jax.block_until_ready(out)
    for f in fmap:
        jax.block_until_ready(f)

    assert out.shape == (batch, 3)        # (b, Hl * period) with Hl == 1 here
    assert len(fmap) == 6
    print("KERNEL_OK")
</pallas_src>

<mosaic_0001>
module attributes {stable_mosaic.version = 11 : i64} {
  func.func @_matmul_bias_act_kernel(%arg0: i32, %arg1: memref<256x192xbf16, #tpu.memory_space<vmem>>, %arg2: memref<192x128xbf16, #tpu.memory_space<vmem>>, %arg3: memref<1x128xf32, #tpu.memory_space<vmem>>, %arg4: memref<256x128xbf16, #tpu.memory_space<vmem>>) attributes {dimension_semantics = [#tpu.dimension_semantics<parallel>], iteration_bounds = array<i64: 1>, scalar_prefetch = 0 : i64, scratch_operands = 0 : i64, tpu.core_type = #tpu.core_type<tc>, window_params = [{transform_indices = @transform_0, window_bounds = array<i64: 256, 192>}, {pipeline_mode = #tpu.pipeline_mode<synchronous>, transform_indices = @transform_1, window_bounds = array<i64: 192, 128>}, {pipeline_mode = #tpu.pipeline_mode<synchronous>, transform_indices = @transform_2, window_bounds = array<i64: 1, 128>}, {transform_indices = @transform_3, window_bounds = array<i64: 256, 128>}]} {
    %c0 = arith.constant 0 : index
    %c0_0 = arith.constant 0 : index
    %0 = vector.load %arg1[%c0, %c0_0] : memref<256x192xbf16, #tpu.memory_space<vmem>>, vector<256x192xbf16>
    %c0_1 = arith.constant 0 : index
    %c0_2 = arith.constant 0 : index
    %1 = vector.load %arg2[%c0_1, %c0_2] : memref<192x128xbf16, #tpu.memory_space<vmem>>, vector<192x128xbf16>
    %cst = arith.constant dense<0.000000e+00> : vector<256x128xf32>
    %2 = tpu.matmul %0, %1, %cst {dimension_numbers = #tpu.dot_dimension_numbers<[1], [0], [0], [1], [0, 0, 1, 1], [], []>} : vector<256x192xbf16>, vector<192x128xbf16>, vector<256x128xf32> -> vector<256x128xf32>
    %c0_3 = arith.constant 0 : index
    %c0_4 = arith.constant 0 : index
    %3 = vector.load %arg3[%c0_3, %c0_4] : memref<1x128xf32, #tpu.memory_space<vmem>>, vector<1x128xf32>
    %4 = vector.broadcast %3 : vector<1x128xf32> to vector<256x128xf32>
    %5 = arith.addf %2, %4 : vector<256x128xf32>
    %cst_5 = arith.constant 0.000000e+00 : f32
    %6 = vector.broadcast %cst_5 : f32 to vector<256x128xf32>
    %7 = arith.cmpf oge, %5, %6 : vector<256x128xf32>
    %cst_6 = arith.constant 0.00999999977 : f32
    %8 = vector.broadcast %cst_6 : f32 to vector<256x128xf32>
    %9 = arith.mulf %8, %5 : vector<256x128xf32>
    %10 = arith.select %7, %5, %9 : vector<256x128xi1>, vector<256x128xf32>
    %11 = arith.truncf %10 : vector<256x128xf32> to vector<256x128xbf16>
    %c0_7 = arith.constant 0 : index
    %c0_8 = arith.constant 0 : index
    %12 = vector.load %arg4[%c0_7, %c0_8] : memref<256x128xbf16, #tpu.memory_space<vmem>>, vector<256x128xbf16>
    tpu.vector_store %arg4[%c0_7, %c0_8], %11 {strides = array<i32>} : memref<256x128xbf16, #tpu.memory_space<vmem>>, vector<256x128xbf16>,
    return
  }
  func.func @transform_0(%arg0: i32) -> (i32, i32) {
    %c0_i32 = arith.constant 0 : i32
    %c0_i32_0 = arith.constant 0 : i32
    return %arg0, %c0_i32 : i32, i32
  }
  func.func @transform_1(%arg0: i32) -> (i32, i32) {
    %c0_i32 = arith.constant 0 : i32
    %c0_i32_0 = arith.constant 0 : i32
    %c0_i32_1 = arith.constant 0 : i32
    return %c0_i32, %c0_i32_0 : i32, i32
  }
  func.func @transform_2(%arg0: i32) -> (i32, i32) {
    %c0_i32 = arith.constant 0 : i32
    %c0_i32_0 = arith.constant 0 : i32
    %c0_i32_1 = arith.constant 0 : i32
    return %c0_i32, %c0_i32_0 : i32, i32
  }
  func.func @transform_3(%arg0: i32) -> (i32, i32) {
    %c0_i32 = arith.constant 0 : i32
    %c0_i32_0 = arith.constant 0 : i32
    return %arg0, %c0_i32 : i32, i32
  }
}

</mosaic_0001>

<bundles_post_ra>
// kernel: tpu_custom_call.1
= control target key start
LH: loop header
LB: loop body
LE: loop exit
PB: predicated region body
PF: predicated region fallthrough
CT: control target
= control target key end

     0   :  { %v1109_v1 = vmov 0   ;;  %vm295_vm0 = vcmask 523264   ;;  %s1330_s0 = inlined_call_operand.vmem [shape: bf16[256,192], index: 0, kind: input, shape index: {}]   ;;  %s1331_s1 = inlined_call_operand.vmem [shape: bf16[192,128], index: 1, kind: input, shape index: {}]   ;;  %s1332_s2 = inlined_call_operand.vmem [shape: f32[1,128], index: 2, kind: input, shape index: {}]   ;;  %s1333_s3 = inlined_call_operand.hbm [shape: bf16[256,128], index: 3, kind: output, shape index: {}]  }
   0x1   :  { %v1025_v0 = vld [vmem:[%s1331_s1] sm:$0xff]   ;;  %344 = vmatprep.subr.bf16.mxu0 %v1109_v1  ;;  %997 = vmatprep.subr.bf16.mxu1 %v1109_v1  ;;  %v1026_v2 = vld [vmem:[%s1331_s1 + $0x8] sm:$0xff]   ;;  %v1027_v3 = vld [vmem:[%s1331_s1 + $0x10] sm:$0xff]  }
   0x2   :  { %345 = vmatpush1.bf16.msra.mxu0 %v1025_v0  ;;  %1009 = vmatpush1.bf16.msra.mxu1 %v1025_v0  ;;  %v1028_v4 = vld [vmem:[%s1331_s1 + $0x18] sm:$0xff]   ;;  %v1039_v5 = vld [vmem:[%s1330_s0 + $0x4] ss:$8 sps:$4 sm:$0xff]   ;;  %v1031_v9 = vld [vmem:[%s1331_s1 + $0x30] sm:$0xff]  }
   0x3   :  { %346 = vmatprep.subr.bf16.mxu0 %v1109_v1  ;;  %998 = vmatprep.subr.bf16.mxu1 %v1109_v1  ;;  %v1029_v6 = vld [vmem:[%s1331_s1 + $0x20] sm:$0xff]   ;;  %v1030_v8 = vld [vmem:[%s1331_s1 + $0x28] sm:$0xff]   ;;  %v1032_v10 = vld [vmem:[%s1331_s1 + $0x38] sm:$0xff]  }
   0x4   :  { %v1042_v7 = vld [vmem:[%s1330_s0 + $0x84] ss:$8 sps:$4 sm:$0xff]   ;;  %822 = vmatprep.mubr.msk.bf16.mxu0 %vm295_vm0, %v1039_v5 }
   0x5   :  { %830 = vmatprep.mubr.msk.bf16.mxu1 %vm295_vm0, %v1042_v7  ;;  %v1033_v11 = vld [vmem:[%s1331_s1 + $0x40] sm:$0xff]  }
   0x6   :  { %347 = vmatpush1.bf16.msra.mxu0 %v1026_v2  ;;  %1010 = vmatpush1.bf16.msra.mxu1 %v1026_v2 }
   0x7   :  { %348 = vmatprep.subr.bf16.mxu0 %v1109_v1  ;;  %999 = vmatprep.subr.bf16.mxu1 %v1109_v1 }
   0xa   :  { %349 = vmatpush1.bf16.msra.mxu0 %v1027_v3  ;;  %1011 = vmatpush1.bf16.msra.mxu1 %v1027_v3 }
   0xb   :  { %350 = vmatprep.subr.bf16.mxu0 %v1109_v1  ;;  %1000 = vmatprep.subr.bf16.mxu1 %v1109_v1 }
   0xe   :  { %351 = vmatpush1.bf16.msra.mxu0 %v1028_v4  ;;  %1012 = vmatpush1.bf16.msra.mxu1 %v1028_v4 }
   0xf   :  { %352 = vmatprep.subr.bf16.mxu0 %v1109_v1  ;;  %1001 = vmatprep.subr.bf16.mxu1 %v1109_v1 }
  0x12   :  { %353 = vmatpush1.bf16.msra.mxu0 %v1029_v6  ;;  %1013 = vmatpush1.bf16.msra.mxu1 %v1029_v6 }
  0x13   :  { %354 = vmatprep.subr.bf16.mxu0 %v1109_v1  ;;  %1002 = vmatprep.subr.bf16.mxu1 %v1109_v1 }
  0x16   :  { %355 = vmatpush1.bf16.msra.mxu0 %v1030_v8  ;;  %1014 = vmatpush1.bf16.msra.mxu1 %v1030_v8 }
  0x17   :  { %356 = vmatprep.subr.bf16.mxu0 %v1109_v1  ;;  %1003 = vmatprep.subr.bf16.mxu1 %v1109_v1 }
  0x1a   :  { %357 = vmatpush1.bf16.msra.mxu0 %v1031_v9  ;;  %1015 = vmatpush1.bf16.msra.mxu1 %v1031_v9 }
  0x1b   :  { %358 = vmatprep.subr.bf16.mxu0 %v1109_v1  ;;  %1004 = vmatprep.subr.bf16.mxu1 %v1109_v1 }
  0x1e   :  { %359 = vmatpush1.bf16.msra.mxu0 %v1032_v10  ;;  %1016 = vmatpush1.bf16.msra.mxu1 %v1032_v10 }
  0x1f   :  { %360 = vmatprep.subr.bf16.mxu0 %v1109_v1  ;;  %1005 = vmatprep.subr.bf16.mxu1 %v1109_v1 }
  0x20   :  { %8 = vsyncpa [#allocation3], 0  ;;  %v1034_v12 = vld [vmem:[%s1331_s1 + $0x48] sm:$0xff]   ;;  %v1035_v13 = vld [vmem:[%s1331_s1 + $0x50] sm:$0xff]  }
  0x21   :  { %v1036_v14 = vld [vmem:[%s1331_s1 + $0x58] sm:$0xff]   ;;  %v1037_v15 = vld [vmem:[%s1330_s0] ss:$8 sps:$4 sm:$0xff]   ;;  %v1049_v21 = vld [vmem:[%s1330_s0 + $0x24] ss:$8 sps:$4 sm:$0xff]  }
  0x22   :  { %361 = vmatpush1.bf16.msra.mxu0 %v1033_v11  ;;  %1017 = vmatpush1.bf16.msra.mxu1 %v1033_v11  ;;  %v1040_v16 = vld [vmem:[%s1330_s0 + $0x80] ss:$8 sps:$4 sm:$0xff]   ;;  %v1043_v17 = vld [vmem:[%s1330_s0 + $0x14] ss:$8 sps:$4 sm:$0xff]   ;;  %v1047_v19 = vld [vmem:[%s1330_s0 + $0x10] ss:$8 sps:$4 sm:$0xff]  }
  0x23   :  { %362 = vmatprep.subr.bf16.mxu0 %v1109_v1  ;;  %1006 = vmatprep.subr.bf16.mxu1 %v1109_v1  ;;  %v1045_v18 = vld [vmem:[%s1330_s0 + $0x94] ss:$8 sps:$4 sm:$0xff]   ;;  %v1048_v20 = vld [vmem:[%s1330_s0 + $0x90] ss:$8 sps:$4 sm:$0xff]   ;;  %v1051_v22 = vld [vmem:[%s1330_s0 + $0xa4] ss:$8 sps:$4 sm:$0xff]  }
  0x24   :  { %v1053_v23 = vld [vmem:[%s1330_s0 + $0x20] ss:$8 sps:$4 sm:$0xff]   ;;  %v1055_v25 = vld [vmem:[%s1330_s0 + $0x34] ss:$8 sps:$4 sm:$0xff]   ;;  %v1059_v27 = vld [vmem:[%s1330_s0 + $0x30] ss:$8 sps:$4 sm:$0xff]  }
  0x25   :  { %v1054_v24 = vld [vmem:[%s1330_s0 + $0xa0] ss:$8 sps:$4 sm:$0xff]   ;;  %v1057_v26 = vld [vmem:[%s1330_s0 + $0xb4] ss:$8 sps:$4 sm:$0xff]   ;;  %v1060_v28 = vld [vmem:[%s1330_s0 + $0xb0] ss:$8 sps:$4 sm:$0xff]  }
  0x26   :  { %363 = vmatpush1.bf16.msra.mxu0 %v1034_v12  ;;  %1018 = vmatpush1.bf16.msra.mxu1 %v1034_v12  ;;  %v1061_v29 = vld [vmem:[%s1330_s0 + $0x44] ss:$8 sps:$4 sm:$0xff]   ;;  %v1065_v31 = vld [vmem:[%s1330_s0 + $0x40] ss:$8 sps:$4 sm:$0xff]   ;;  %v1067_v33 = vld [vmem:[%s1330_s0 + $0x54] ss:$8 sps:$4 sm:$0xff]  }
  0x27   :  { %364 = vmatprep.subr.bf16.mxu0 %v1109_v1  ;;  %1007 = vmatprep.subr.bf16.mxu1 %v1109_v1  ;;  %v1063_v30 = vld [vmem:[%s1330_s0 + $0xc4] ss:$8 sps:$4 sm:$0xff]   ;;  %v1066_v32 = vld [vmem:[%s1330_s0 + $0xc0] ss:$8 sps:$4 sm:$0xff]   ;;  %v1069_v34 = vld [vmem:[%s1330_s0 + $0xd4] ss:$8 sps:$4 sm:$0xff]  }
  0x28   :  { %v1071_v35 = vld [vmem:[%s1330_s0 + $0x50] ss:$8 sps:$4 sm:$0xff]   ;;  %v1073_v37 = vld [vmem:[%s1330_s0 + $0x64] ss:$8 sps:$4 sm:$0xff]   ;;  %v1077_v39 = vld [vmem:[%s1330_s0 + $0x60] ss:$8 sps:$4 sm:$0xff]  }
  0x29   :  { %v1072_v36 = vld [vmem:[%s1330_s0 + $0xd0] ss:$8 sps:$4 sm:$0xff]   ;;  %v1075_v38 = vld [vmem:[%s1330_s0 + $0xe4] ss:$8 sps:$4 sm:$0xff]   ;;  %v1078_v40 = vld [vmem:[%s1330_s0 + $0xe0] ss:$8 sps:$4 sm:$0xff]  }
  0x2a   :  { %365 = vmatpush1.bf16.msra.mxu0 %v1035_v13  ;;  %1019 = vmatpush1.bf16.msra.mxu1 %v1035_v13  ;;  %v1079_v41 = vld [vmem:[%s1330_s0 + $0x74] ss:$8 sps:$4 sm:$0xff]   ;;  %v1083_v43 = vld [vmem:[%s1330_s0 + $0x70] ss:$8 sps:$4 sm:$0xff]   ;;  %v1284_v45 = vld [vmem:[%s1332_s2] ss:$0 sm:$0xff] }
  0x2b   :  { %366 = vmatprep.subr.bf16.mxu0 %v1109_v1  ;;  %1008 = vmatprep.subr.bf16.mxu1 %v1109_v1  ;;  %v1081_v42 = vld [vmem:[%s1330_s0 + $0xf4] ss:$8 sps:$4 sm:$0xff]   ;;  %v1084_v44 = vld [vmem:[%s1330_s0 + $0xf0] ss:$8 sps:$4 sm:$0xff]   ;;  %s1110_s0 = smov [#allocation2]  }
  0x2c   :  { %s766_s2 = sshll.u32 %s1110_s0, 4  ;;  %s767_s2 = int_to_ptr.vmem [resolvable:$true] %s766_s2 }
  0x2d   :  { %s1085_s19 = scalar_lea.vmem %s767_s2, 2048  ;;  %p1090_p1 = scmp.lt.s32.totalorder %s767_s2, %s767_s2 }
  0x2e   :  { %367 = vmatpush1.bf16.msra.mxu0 %v1036_v14  ;;  %1020 = vmatpush1.bf16.msra.mxu1 %v1036_v14  ;;  %p1086_p0 = scmp.ne.s32.totalorder %s767_s2, %s1085_s19  ;;  %p1091_p2 = scmp.lt.s32.totalorder %s1085_s19, %s1085_s19 }
  0x30   :  { %p1092_p3 = por %p1091_p2, %p1090_p1 }
  0x31   :  { %377 = vmatmul.mubr.bf16.vlgmr.msra.gmra.mrb[0].mxu0 %v1037_v15  ;;  %441 = vmatmul.mubr.bf16.vlgmr.msra.gmra.mrb[0].mxu1 %v1040_v16 }
  0x32   :  { %823 = vmatprep.mubr.msk.bf16.mxu0 %vm295_vm0, %v1043_v17  ;;  %831 = vmatprep.mubr.msk.bf16.mxu1 %vm295_vm0, %v1045_v18  ;;  %p1093_p4 = pnand %p1092_p3, %p1086_p0 }
  0x39   :  { %385 = vmatmul.mubr.bf16.gmra.mrb[4].mxu0 %v1047_v19  ;;  %449 = vmatmul.mubr.bf16.gmra.mrb[4].mxu1 %v1048_v20 }
  0x3a   :  { %824 = vmatprep.mubr.msk.bf16.mxu0 %vm295_vm0, %v1049_v21  ;;  %832 = vmatprep.mubr.msk.bf16.mxu1 %vm295_vm0, %v1051_v22 }
  0x41   :  { %393 = vmatmul.mubr.bf16.gmra.mrb[8].mxu0 %v1053_v23  ;;  %457 = vmatmul.mubr.bf16.gmra.mrb[8].mxu1 %v1054_v24 }
  0x42   :  { %825 = vmatprep.mubr.msk.bf16.mxu0 %vm295_vm0, %v1055_v25  ;;  %833 = vmatprep.mubr.msk.bf16.mxu1 %vm295_vm0, %v1057_v26 }
  0x49   :  { %401 = vmatmul.mubr.bf16.gmra.mrb[12].mxu0 %v1059_v27  ;;  %465 = vmatmul.mubr.bf16.gmra.mrb[12].mxu1 %v1060_v28 }
  0x4a   :  { %826 = vmatprep.mubr.msk.bf16.mxu0 %vm295_vm0, %v1061_v29  ;;  %834 = vmatprep.mubr.msk.bf16.mxu1 %vm295_vm0, %v1063_v30 }
  0x51   :  { %409 = vmatmul.mubr.bf16.gmra.mrb[16].mxu0 %v1065_v31  ;;  %473 = vmatmul.mubr.bf16.gmra.mrb[16].mxu1 %v1066_v32 }
  0x52   :  { %827 = vmatprep.mubr.msk.bf16.mxu0 %vm295_vm0, %v1067_v33  ;;  %835 = vmatprep.mubr.msk.bf16.mxu1 %vm295_vm0, %v1069_v34 }
  0x59   :  { %417 = vmatmul.mubr.bf16.gmra.mrb[20].mxu0 %v1071_v35  ;;  %481 = vmatmul.mubr.bf16.gmra.mrb[20].mxu1 %v1072_v36 }
  0x5a   :  { %828 = vmatprep.mubr.msk.bf16.mxu0 %vm295_vm0, %v1073_v37  ;;  %836 = vmatprep.mubr.msk.bf16.mxu1 %vm295_vm0, %v1075_v38 }
  0x61   :  { %425 = vmatmul.mubr.bf16.gmra.mrb[24].mxu0 %v1077_v39  ;;  %489 = vmatmul.mubr.bf16.gmra.mrb[24].mxu1 %v1078_v40 }
  0x62   :  { %829 = vmatprep.mubr.msk.bf16.mxu0 %vm295_vm0, %v1079_v41  ;;  %837 = vmatprep.mubr.msk.bf16.mxu1 %vm295_vm0, %v1081_v42 }
  0x69   :  { %433 = vmatmul.mubr.bf16.gmra.mrb[28].mxu0 %v1083_v43  ;;  %497 = vmatmul.mubr.bf16.gmra.mrb[28].mxu1 %v1084_v44 }
 0x104   :  { %v378_v46 = vpop.f32.mrb[0].mxu0  ;;  %v442_v47 = vpop.f32.mrb[0].mxu1 }
 0x105   :  { %v379_v48 = vadd.f32 %v1284_v45, %v378_v46  ;;  %v443_v49 = vadd.f32 %v1284_v45, %v442_v47  ;;  %v380_v50 = vpop.f32.mrb[1].mxu0  ;;  %v444_v51 = vpop.f32.mrb[1].mxu1 }
 0x106   :  { %v381_v52 = vpop.f32.mrb[2].mxu0  ;;  %v445_v53 = vpop.f32.mrb[2].mxu1 }
 0x107   :  { %v537_v54 = vmul.f32 0.01, %v379_v48  ;;  %v553_v55 = vmul.f32 0.01, %v443_v49  ;;  %v382_v56 = vadd.f32 %v1284_v45, %v381_v52  ;;  %v446_v57 = vadd.f32 %v1284_v45, %v445_v53  ;;  %v383_v58 = vpop.f32.mrb[3].mxu0  ;;  %v447_v59 = vpop.f32.mrb[3].mxu1 }
 0x108   :  { %vm505_vm1 = vcmp.ge.f32.partialorder %v379_v48, 0.0  ;;  %vm521_vm2 = vcmp.ge.f32.partialorder %v443_v49, 0.0 }
 0x109   :  { %vm506_vm3 = vcmp.ge.f32.partialorder %v382_v56, 0.0  ;;  %v538_v60 = vmul.f32 0.01, %v382_v56  ;;  %vm522_vm4 = vcmp.ge.f32.partialorder %v446_v57, 0.0  ;;  %v554_v61 = vmul.f32 0.01, %v446_v57 }
 0x10a   :  { %v569_v62 = vsel %vm505_vm1, %v379_v48, %v537_v54  ;;  %v585_v63 = vsel %vm521_vm2, %v443_v49, %v553_v55 }
 0x10b   :  { %v570_v0 = vsel %vm506_vm3, %v382_v56, %v538_v60  ;;  %v586_v1 = vsel %vm522_vm4, %v446_v57, %v554_v61 }
 0x10c   :  { %v386_v2 = vpop.f32.mrb[4].mxu0  ;;  %v450_v3 = vpop.f32.mrb[4].mxu1  ;;  %v905_v4 = vpack.c.bf16 %v570_v0, %v569_v62  ;;  %v945_v5 = vpack.c.bf16 %v586_v1, %v585_v63 }
 0x10d   :  { %v387_v6 = vadd.f32 %v1284_v45, %v386_v2  ;;  %v451_v7 = vadd.f32 %v1284_v45, %v450_v3  ;;  %v388_v8 = vpop.f32.mrb[5].mxu0  ;;  %v452_v9 = vpop.f32.mrb[5].mxu1 }
 0x10e   :  { %v389_v10 = vpop.f32.mrb[6].mxu0  ;;  %v453_v11 = vpop.f32.mrb[6].mxu1  ;;  %906 = vst [vmem:[#allocation2] sm:$0xff] %v905_v4   ;;  %989 = vst [vmem:[#allocation2 + $0x40] sm:$0xff] %v945_v5  }
 0x10f   :  { %v539_v12 = vmul.f32 0.01, %v387_v6  ;;  %v555_v13 = vmul.f32 0.01, %v451_v7  ;;  %v390_v14 = vadd.f32 %v1284_v45, %v389_v10  ;;  %v454_v15 = vadd.f32 %v1284_v45, %v453_v11  ;;  %v391_v16 = vpop.f32.mrb[7].mxu0  ;;  %v455_v17 = vpop.f32.mrb[7].mxu1 }
 0x110   :  { %vm507_vm5 = vcmp.ge.f32.partialorder %v387_v6, 0.0  ;;  %vm523_vm6 = vcmp.ge.f32.partialorder %v451_v7, 0.0 }
 0x111   :  { %vm508_vm7 = vcmp.ge.f32.partialorder %v390_v14, 0.0  ;;  %v540_v18 = vmul.f32 0.01, %v390_v14  ;;  %vm524_vm8 = vcmp.ge.f32.partialorder %v454_v15, 0.0  ;;  %v556_v19 = vmul.f32 0.01, %v454_v15 }
 0x112   :  { %v571_v20 = vsel %vm507_vm5, %v387_v6, %v539_v12  ;;  %v587_v21 = vsel %vm523_vm6, %v451_v7, %v555_v13 }
 0x113   :  { %v572_v22 = vsel %vm508_vm7, %v390_v14, %v540_v18  ;;  %v588_v23 = vsel %vm524_vm8, %v454_v15, %v556_v19 }
 0x114   :  { %v394_v24 = vpop.f32.mrb[8].mxu0  ;;  %v458_v25 = vpop.f32.mrb[8].mxu1  ;;  %v910_v26 = vpack.c.bf16 %v572_v22, %v571_v20  ;;  %v950_v27 = vpack.c.bf16 %v588_v23, %v587_v21 }
 0x115   :  { %v395_v28 = vadd.f32 %v1284_v45, %v394_v24  ;;  %v459_v29 = vadd.f32 %v1284_v45, %v458_v25  ;;  %v396_v30 = vpop.f32.mrb[9].mxu0  ;;  %v460_v31 = vpop.f32.mrb[9].mxu1 }
 0x116   :  { %v397_v32 = vpop.f32.mrb[10].mxu0  ;;  %v461_v33 = vpop.f32.mrb[10].mxu1  ;;  %982 = vst [vmem:[#allocation2 + $0x8] sm:$0xff] %v910_v26   ;;  %990 = vst [vmem:[#allocation2 + $0x48] sm:$0xff] %v950_v27  }
 0x117   :  { %v541_v34 = vmul.f32 0.01, %v395_v28  ;;  %v557_v35 = vmul.f32 0.01, %v459_v29  ;;  %v398_v36 = vadd.f32 %v1284_v45, %v397_v32  ;;  %v462_v37 = vadd.f32 %v1284_v45, %v461_v33  ;;  %v399_v38 = vpop.f32.mrb[11].mxu0  ;;  %v463_v39 = vpop.f32.mrb[11].mxu1 }
 0x118   :  { %vm509_vm9 = vcmp.ge.f32.partialorder %v395_v28, 0.0  ;;  %vm525_vm10 = vcmp.ge.f32.partialorder %v459_v29, 0.0 }
 0x119   :  { %vm510_vm11 = vcmp.ge.f32.partialorder %v398_v36, 0.0  ;;  %v542_v40 = vmul.f32 0.01, %v398_v36  ;;  %vm526_vm12 = vcmp.ge.f32.partialorder %v462_v37, 0.0  ;;  %v558_v41 = vmul.f32 0.01, %v462_v37 }
 0x11a   :  { %v573_v42 = vsel %vm509_vm9, %v395_v28, %v541_v34  ;;  %v589_v43 = vsel %vm525_vm10, %v459_v29, %v557_v35 }
 0x11b   :  { %v574_v44 = vsel %vm510_vm11, %v398_v36, %v542_v40  ;;  %v590_v46 = vsel %vm526_vm12, %v462_v37, %v558_v41 }
 0x11c   :  { %v402_v47 = vpop.f32.mrb[12].mxu0  ;;  %v466_v48 = vpop.f32.mrb[12].mxu1  ;;  %v915_v49 = vpack.c.bf16 %v574_v44, %v573_v42  ;;  %v955_v50 = vpack.c.bf16 %v590_v46, %v589_v43 }
 0x11d   :  { %v403_v51 = vadd.f32 %v1284_v45, %v402_v47  ;;  %v467_v52 = vadd.f32 %v1284_v45, %v466_v48  ;;  %v404_v53 = vpop.f32.mrb[13].mxu0  ;;  %v468_v54 = vpop.f32.mrb[13].mxu1 }
 0x11e   :  { %v405_v55 = vpop.f32.mrb[14].mxu0  ;;  %v469_v56 = vpop.f32.mrb[14].mxu1  ;;  %983 = vst [vmem:[#allocation2 + $0x10] sm:$0xff] %v915_v49   ;;  %991 = vst [vmem:[#allocation2 + $0x50] sm:$0xff] %v955_v50  }
 0x11f   :  { %v543_v57 = vmul.f32 0.01, %v403_v51  ;;  %v559_v58 = vmul.f32 0.01, %v467_v52  ;;  %v406_v59 = vadd.f32 %v1284_v45, %v405_v55  ;;  %v470_v60 = vadd.f32 %v1284_v45, %v469_v56  ;;  %v407_v61 = vpop.f32.mrb[15].mxu0  ;;  %v471_v62 = vpop.f32.mrb[15].mxu1 }
 0x120   :  { %vm511_vm13 = vcmp.ge.f32.partialorder %v403_v51, 0.0  ;;  %vm527_vm14 = vcmp.ge.f32.partialorder %v467_v52, 0.0 }
 0x121   :  { %vm512_vm15 = vcmp.ge.f32.partialorder %v406_v59, 0.0  ;;  %v544_v63 = vmul.f32 0.01, %v406_v59  ;;  %vm528_vm0 = vcmp.ge.f32.partialorder %v470_v60, 0.0  ;;  %v560_v0 = vmul.f32 0.01, %v470_v60 }
 0x122   :  { %v575_v1 = vsel %vm511_vm13, %v403_v51, %v543_v57  ;;  %v591_v2 = vsel %vm527_vm14, %v467_v52, %v559_v58 }
 0x123   :  { %v576_v3 = vsel %vm512_vm15, %v406_v59, %v544_v63  ;;  %v592_v4 = vsel %vm528_vm0, %v470_v60, %v560_v0 }
 0x124   :  { %v410_v5 = vpop.f32.mrb[16].mxu0  ;;  %v474_v6 = vpop.f32.mrb[16].mxu1  ;;  %v920_v7 = vpack.c.bf16 %v576_v3, %v575_v1  ;;  %v960_v8 = vpack.c.bf16 %v592_v4, %v591_v2 }
 0x125   :  { %v411_v9 = vadd.f32 %v1284_v45, %v410_v5  ;;  %v475_v10 = vadd.f32 %v1284_v45, %v474_v6  ;;  %v412_v11 = vpop.f32.mrb[17].mxu0  ;;  %v476_v12 = vpop.f32.mrb[17].mxu1 }
 0x126   :  { %v413_v13 = vpop.f32.mrb[18].mxu0  ;;  %v477_v14 = vpop.f32.mrb[18].mxu1  ;;  %984 = vst [vmem:[#allocation2 + $0x18] sm:$0xff] %v920_v7   ;;  %992 = vst [vmem:[#allocation2 + $0x58] sm:$0xff] %v960_v8  }
 0x127   :  { %v545_v15 = vmul.f32 0.01, %v411_v9  ;;  %v561_v16 = vmul.f32 0.01, %v475_v10  ;;  %v414_v17 = vadd.f32 %v1284_v45, %v413_v13  ;;  %v478_v18 = vadd.f32 %v1284_v45, %v477_v14  ;;  %v415_v19 = vpop.f32.mrb[19].mxu0  ;;  %v479_v20 = vpop.f32.mrb[19].mxu1 }
 0x128   :  { %vm513_vm1 = vcmp.ge.f32.partialorder %v411_v9, 0.0  ;;  %vm529_vm2 = vcmp.ge.f32.partialorder %v475_v10, 0.0 }
 0x129   :  { %vm514_vm3 = vcmp.ge.f32.partialorder %v414_v17, 0.0  ;;  %v546_v21 = vmul.f32 0.01, %v414_v17  ;;  %vm530_vm4 = vcmp.ge.f32.partialorder %v478_v18, 0.0  ;;  %v562_v22 = vmul.f32 0.01, %v478_v18 }
 0x12a   :  { %v577_v23 = vsel %vm513_vm1, %v411_v9, %v545_v15  ;;  %v593_v24 = vsel %vm529_vm2, %v475_v10, %v561_v16 }
 0x12b   :  { %v578_v25 = vsel %vm514_vm3, %v414_v17, %v546_v21  ;;  %v594_v26 = vsel %vm530_vm4, %v478_v18, %v562_v22 }
 0x12c   :  { %v418_v27 = vpop.f32.mrb[20].mxu0  ;;  %v482_v28 = vpop.f32.mrb[20].mxu1  ;;  %v925_v29 = vpack.c.bf16 %v578_v25, %v577_v23  ;;  %v965_v30 = vpack.c.bf16 %v594_v26, %v593_v24 }
 0x12d   :  { %v419_v31 = vadd.f32 %v1284_v45, %v418_v27  ;;  %v483_v32 = vadd.f32 %v1284_v45, %v482_v28  ;;  %v420_v33 = vpop.f32.mrb[21].mxu0  ;;  %v484_v34 = vpop.f32.mrb[21].mxu1 }
 0x12e   :  { %v421_v35 = vpop.f32.mrb[22].mxu0  ;;  %v485_v36 = vpop.f32.mrb[22].mxu1  ;;  %985 = vst [vmem:[#allocation2 + $0x20] sm:$0xff] %v925_v29   ;;  %993 = vst [vmem:[#allocation2 + $0x60] sm:$0xff] %v965_v30  }
 0x12f   :  { %v547_v37 = vmul.f32 0.01, %v419_v31  ;;  %v563_v38 = vmul.f32 0.01, %v483_v32  ;;  %v422_v39 = vadd.f32 %v1284_v45, %v421_v35  ;;  %v486_v40 = vadd.f32 %v1284_v45, %v485_v36  ;;  %v423_v41 = vpop.f32.mrb[23].mxu0  ;;  %v487_v42 = vpop.f32.mrb[23].mxu1 }
 0x130   :  { %vm515_vm5 = vcmp.ge.f32.partialorder %v419_v31, 0.0  ;;  %vm531_vm6 = vcmp.ge.f32.partialorder %v483_v32, 0.0 }
 0x131   :  { %vm516_vm7 = vcmp.ge.f32.partialorder %v422_v39, 0.0  ;;  %v548_v43 = vmul.f32 0.01, %v422_v39  ;;  %vm532_vm8 = vcmp.ge.f32.partialorder %v486_v40, 0.0  ;;  %v564_v44 = vmul.f32 0.01, %v486_v40 }
 0x132   :  { %v579_v46 = vsel %vm515_vm5, %v419_v31, %v547_v37  ;;  %v595_v47 = vsel %vm531_vm6, %v483_v32, %v563_v38 }
 0x133   :  { %v580_v48 = vsel %vm516_vm7, %v422_v39, %v548_v43  ;;  %v596_v49 = vsel %vm532_vm8, %v486_v40, %v564_v44 }
 0x134   :  { %v426_v50 = vpop.f32.mrb[24].mxu0  ;;  %v490_v51 = vpop.f32.mrb[24].mxu1  ;;  %v930_v52 = vpack.c.bf16 %v580_v48, %v579_v46  ;;  %v970_v53 = vpack.c.bf16 %v596_v49, %v595_v47 }
 0x135   :  { %v427_v54 = vadd.f32 %v1284_v45, %v426_v50  ;;  %v491_v55 = vadd.f32 %v1284_v45, %v490_v51  ;;  %v428_v56 = vpop.f32.mrb[25].mxu0  ;;  %v492_v57 = vpop.f32.mrb[25].mxu1 }
 0x136   :  { %v429_v58 = vpop.f32.mrb[26].mxu0  ;;  %v493_v59 = vpop.f32.mrb[26].mxu1  ;;  %986 = vst [vmem:[#allocation2 + $0x28] sm:$0xff] %v930_v52   ;;  %994 = vst [vmem:[#allocation2 + $0x68] sm:$0xff] %v970_v53  }
 0x137   :  { %v549_v60 = vmul.f32 0.01, %v427_v54  ;;  %v565_v61 = vmul.f32 0.01, %v491_v55  ;;  %v430_v62 = vadd.f32 %v1284_v45, %v429_v58  ;;  %v494_v63 = vadd.f32 %v1284_v45, %v493_v59  ;;  %v431_v0 = vpop.f32.mrb[27].mxu0  ;;  %v495_v1 = vpop.f32.mrb[27].mxu1 }
 0x138   :  { %vm517_vm9 = vcmp.ge.f32.partialorder %v427_v54, 0.0  ;;  %vm533_vm10 = vcmp.ge.f32.partialorder %v491_v55, 0.0 }
 0x139   :  { %vm518_vm11 = vcmp.ge.f32.partialorder %v430_v62, 0.0  ;;  %v550_v2 = vmul.f32 0.01, %v430_v62  ;;  %vm534_vm12 = vcmp.ge.f32.partialorder %v494_v63, 0.0  ;;  %v566_v3 = vmul.f32 0.01, %v494_v63 }
 0x13a   :  { %v581_v4 = vsel %vm517_vm9, %v427_v54, %v549_v60  ;;  %v597_v5 = vsel %vm533_vm10, %v491_v55, %v565_v61 }
 0x13b   :  { %v582_v6 = vsel %vm518_vm11, %v430_v62, %v550_v2  ;;  %v598_v7 = vsel %vm534_vm12, %v494_v63, %v566_v3 }
 0x13c   :  { %v434_v8 = vpop.f32.mrb[28].mxu0  ;;  %v498_v9 = vpop.f32.mrb[28].mxu1  ;;  %v935_v10 = vpack.c.bf16 %v582_v6, %v581_v4  ;;  %v975_v11 = vpack.c.bf16 %v598_v7, %v597_v5 }
 0x13d   :  { %v435_v12 = vadd.f32 %v1284_v45, %v434_v8  ;;  %v499_v13 = vadd.f32 %v1284_v45, %v498_v9  ;;  %v436_v14 = vpop.f32.mrb[29].mxu0  ;;  %v500_v15 = vpop.f32.mrb[29].mxu1 }
 0x13e   :  { %v437_v16 = vpop.f32.mrb[30].mxu0  ;;  %v501_v17 = vpop.f32.mrb[30].mxu1  ;;  %987 = vst [vmem:[#allocation2 + $0x30] sm:$0xff] %v935_v10   ;;  %995 = vst [vmem:[#allocation2 + $0x70] sm:$0xff] %v975_v11  }
 0x13f   :  { %v551_v18 = vmul.f32 0.01, %v435_v12  ;;  %v567_v19 = vmul.f32 0.01, %v499_v13  ;;  %v438_v20 = vadd.f32 %v1284_v45, %v437_v16  ;;  %v502_v21 = vadd.f32 %v1284_v45, %v501_v17  ;;  %v439_v22 = vpop.f32.mrb[31].mxu0  ;;  %v503_v23 = vpop.f32.mrb[31].mxu1 }
 0x140   :  { %vm519_vm13 = vcmp.ge.f32.partialorder %v435_v12, 0.0  ;;  %vm535_vm14 = vcmp.ge.f32.partialorder %v499_v13, 0.0 }
 0x141   :  { %vm520_vm15 = vcmp.ge.f32.partialorder %v438_v20, 0.0  ;;  %v552_v24 = vmul.f32 0.01, %v438_v20  ;;  %vm536_vm0 = vcmp.ge.f32.partialorder %v502_v21, 0.0  ;;  %v568_v25 = vmul.f32 0.01, %v502_v21 }
 0x142   :  { %v583_v26 = vsel %vm519_vm13, %v435_v12, %v551_v18  ;;  %v599_v27 = vsel %vm535_vm14, %v499_v13, %v567_v19 }
 0x143   :  { %v584_v28 = vsel %vm520_vm15, %v438_v20, %v552_v24  ;;  %v600_v29 = vsel %vm536_vm0, %v502_v21, %v568_v25 }
 0x144   :  { %v940_v30 = vpack.c.bf16 %v584_v28, %v583_v26  ;;  %v980_v31 = vpack.c.bf16 %v600_v29, %v599_v27 }
 0x146   :  { %988 = vst [vmem:[#allocation2 + $0x38] sm:$0xff] %v940_v30   ;;  %996 = vst [vmem:[#allocation2 + $0x78] sm:$0xff] %v980_v31  }
 0x147   :  { %1096 = shalt.err (!%p1093_p4)
}
 0x148   :  { %s1097_s21 = scalar_lea.hbm %s1333_s3, 2048 }
 0x149   :  { %p1098_p5 = scmp.ne.s32.totalorder %s1333_s3, %s1097_s21  ;;  %p1101_p6 = scmp.lt.u32.totalorder %s1097_s21, %s1333_s3 }
 0x14b   :  { %p1103_p7 = pnand %p1101_p6, %p1098_p5 }
 0x14d   :  { %1106 = shalt.err (!%p1103_p7)
}
 0x14e   :  { %s1111_s26 = smov 64   ;;  %s1112_s27 = smov 4  }
 0x14f   :  { %772 = dma.vmem_to_hbm [thread:$0]  %s767_s2, 2048, %s1333_s3, [#allocation3], %s1111_s26, %s1111_s26, %s1112_s27  }
 0x150   :  { %1107 = dma.done.wait [#allocation3], 2048  }
 0x151   :  { %1108 = vsyncadd [#allocation3], 4294965248 }
 0x152   :  { %776 = vsyncpa [#allocation3], 1 }

</bundles_post_ra>
